<compile_context>
chip_gen: v5e
topology: v5e:2x2
jax: 0.10.0
libtpu: 0.0.40
codegen_flags: <defaults>
</compile_context>

<pallas_src>
import jax
import jax.numpy as jnp
from jax.experimental import pallas as pl
from jax.experimental.pallas import tpu as pltpu


def _make_kernel_bn(T, C):
    def kernel(d1_ref, d2_ref, w1tt_ref, bnb_ref, w2t_ref, o_ref):
        d1 = d1_ref[0]                                  # (T, C, HWt)
        d2 = d2_ref[0]                                  # (T, C, HWt)
        hwt = d1.shape[-1]
        # Layout-trivial merge (C % 8 == 0 by module construction): the temporal
        # mean is folded into the contraction (K = T*C) instead of VPU adds.
        d1f = d1.reshape(T * C, hwt)
        d2f = d2.reshape(T * C, hwt)

        # grouped 1x1x1 conv #1 with BN scale and 1/T folded into w1tt -> (SQ, HWt)
        hid = (jnp.dot(w1tt_ref[...], d1f, preferred_element_type=jnp.float32)
               + jnp.dot(w1tt_ref[...], d2f, preferred_element_type=jnp.float32))
        hid = jnp.maximum(hid + bnb_ref[...], 0.0)      # BN bias + ReLU

        # grouped 1x1x1 conv #2                          -> (2C, HWt)
        logits = jnp.dot(w2t_ref[...], hid, preferred_element_type=jnp.float32)

        # 2-way softmax over the branch axis == sigmoid (exact, column-local)
        y0 = logits[:C, :]
        y1 = logits[C:, :]
        a0 = 1.0 / (1.0 + jnp.exp(y1 - y0))

        out = d2 + (d1 - d2) * a0[None]                 # == d1*a0 + d2*(1-a0)
        o_ref[0] = out.astype(o_ref.dtype)

    return kernel


def _make_kernel_nobn(T, C):
    def kernel(d1_ref, d2_ref, w12tt_ref, o_ref):
        d1 = d1_ref[0]                                  # (T, C, HWt)
        d2 = d2_ref[0]
        hwt = d1.shape[-1]
        d1f = d1.reshape(T * C, hwt)
        d2f = d2.reshape(T * C, hwt)
        # n_batch == 1: no BN/ReLU, convs composed into one matmul; 1/T folded.
        logits = (jnp.dot(w12tt_ref[...], d1f, preferred_element_type=jnp.float32)
                  + jnp.dot(w12tt_ref[...], d2f, preferred_element_type=jnp.float32))
        y0 = logits[:C, :]
        y1 = logits[C:, :]
        a0 = 1.0 / (1.0 + jnp.exp(y1 - y0))
        out = d2 + (d1 - d2) * a0[None]
        o_ref[0] = out.astype(o_ref.dtype)

    return kernel


def _vmem_capacity_bytes():
    """Physical VMEM per TensorCore; conservative (v7x-sized) fallback."""
    try:
        info = pltpu.get_tpu_info()
        cap = getattr(info, "vmem_capacity_bytes", None)
        if cap:
            return int(cap)
    except Exception:
        pass
    return 64 << 20


def _choose_hw_tile(hw, T, c, itemsize, data_budget_bytes, min_hw_blocks):
    """Pick the lane (hw) tile.

    - Multiple of 128 whenever a split is possible (lane-dense unmasked stores
      on all full blocks; only the cdiv-grid tail block is masked).
    - Sized into the measured HBM-roofline plateau (>=512 lanes when budget and
      hw allow), capped by the per-generation VMEM data budget.
    - When min_hw_blocks > 1 (n_batch == 1 on a 2-TC chip), make sure hw splits
      into >=2 roughly balanced blocks so both TensorCores get work.
    """
    per_lane_bytes = 6 * T * c * itemsize             # 3 streams x 2 buffers
    max_by_budget = max(128, int(data_budget_bytes // per_lane_bytes) // 128 * 128)
    tile = min(max_by_budget, 2048)                   # plateau; bounded per-step cost
    if tile >= hw:
        tile = hw                                     # single full-width block
    if min_hw_blocks > 1 and hw > 128 and pl.cdiv(hw, tile) < min_hw_blocks:
        balanced = pl.cdiv(pl.cdiv(hw, min_hw_blocks), 128) * 128
        tile = max(128, min(max_by_budget, balanced))
    return tile


def msm_pallas(d1, d2, w1_full, w2_full, bn_scale, bn_bias, num_segments):
    """d1, d2: (nt, c, h, w) NCHW (f32 or bf16), like the PyTorch module."""
    nt, c, h, w = d1.shape
    T = num_segments
    n = nt // T
    hw = h * w
    sq = w1_full.shape[1]
    apply_bn = (n != 1)
    itemsize = jnp.dtype(d1.dtype).itemsize
    inv_T = 1.0 / float(T)

    # Per-generation budgets: never request the full physical VMEM.
    vmem_cap = _vmem_capacity_bytes()
    if vmem_cap >= (100 << 20):                        # v5e / v6e (128 MiB)
        data_budget, vmem_ceiling = 48 << 20, 96 << 20
    else:                                              # v7x (64 MiB / TC)
        data_budget, vmem_ceiling = 20 << 20, 48 << 20

    min_hw_blocks = 2 if n == 1 else 1                 # feed both TCs on v7x
    hw_tile = _choose_hw_tile(hw, T, c, itemsize, data_budget, min_hw_blocks)
    n_hw = pl.cdiv(hw, hw_tile)                        # ragged tail auto-masked

    # Pure reshapes only -- no transpose, no extra HBM pass.
    d1k = d1.reshape(n, T, c, hw)
    d2k = d2.reshape(n, T, c, hw)

    data_spec = pl.BlockSpec((1, T, c, hw_tile), lambda b, s: (b, 0, 0, s))

    f32 = jnp.float32
    if apply_bn:
        # Fold BN scale into conv1 weights and 1/T (temporal mean) into the
        # T-tiled weight; keep only the BN bias for the kernel.
        w1t = (w1_full.astype(f32) * bn_scale.astype(f32)[None, :]).T   # (sq, c)
        w1tt = jnp.tile(w1t * inv_T, (1, T))                            # (sq, T*c)
        w2t = w2_full.astype(f32).T                                     # (2c, sq)
        bnb = bn_bias.astype(f32).reshape(sq, 1)
        kernel = _make_kernel_bn(T, c)
        weight_args = (w1tt, bnb, w2t)
        weight_specs = [
            pl.BlockSpec((sq, T * c), lambda b, s: (0, 0)),
            pl.BlockSpec((sq, 1), lambda b, s: (0, 0)),
            pl.BlockSpec((2 * c, sq), lambda b, s: (0, 0)),
        ]
    else:
        # n_batch == 1: no BN/ReLU, so the two linear maps compose; fold 1/T.
        w12t = (w1_full.astype(f32) @ w2_full.astype(f32)).T            # (2c, c)
        w12tt = jnp.tile(w12t * inv_T, (1, T))                          # (2c, T*c)
        kernel = _make_kernel_nobn(T, c)
        weight_args = (w12tt,)
        weight_specs = [pl.BlockSpec((2 * c, T * c), lambda b, s: (0, 0))]

    # Scoped-VMEM request from actual usage (no double-counting of buffering):
    # double-buffered data blocks + in-kernel f32 temporaries + weights + margin.
    tile_bytes = T * c * hw_tile * itemsize
    data_bytes = 6 * tile_bytes                        # 3 streams x 2 buffers
    temp_bytes = 2 * T * c * hw_tile * 4               # f32 temporaries estimate
    weight_bytes = 2 * sum(int(wa.size) * jnp.dtype(wa.dtype).itemsize
                           for wa in weight_args)
    vmem_limit = int(min(vmem_ceiling,
                         max(16 << 20,
                             data_bytes + temp_bytes + weight_bytes + (4 << 20))))

    # Advisory cost: pure HBM-streaming op (read d1, read d2, write out).
    bytes_accessed = 3 * n * T * c * hw * itemsize + weight_bytes // 2
    flops = n * hw * (4 * sq * T * c + 4 * c * sq + 6 * T * c)
    cost = pl.CostEstimate(flops=int(flops),
                           transcendentals=int(n * c * hw),
                           bytes_accessed=int(bytes_accessed))

    out = pl.pallas_call(
        kernel,
        out_shape=jax.ShapeDtypeStruct((n, T, c, hw), d1.dtype),
        grid_spec=pltpu.PrefetchScalarGridSpec(
            num_scalar_prefetch=0,
            grid=(n, n_hw),
            in_specs=[data_spec, data_spec, *weight_specs],
            out_specs=data_spec,
        ),
        compiler_params=pltpu.CompilerParams(
            dimension_semantics=("parallel", "parallel"),
            vmem_limit_bytes=vmem_limit,
        ),
        cost_estimate=cost,
    )(d1k, d2k, *weight_args)

    return out.reshape(nt, c, h, w)


def expand_grouped_weight(w, in_ch, groups):
    """w: (out_ch, in_ch // groups) grouped-conv weight -> dense block-diagonal
    (in_ch, out_ch) matrix equivalent to the grouped 1x1x1 conv."""
    out_ch = w.shape[0]
    og = out_ch // groups
    ig = in_ch // groups
    full = jnp.zeros((in_ch, out_ch), w.dtype)
    for o in range(out_ch):
        g = o // og
        full = full.at[g * ig:(g + 1) * ig, o].set(w[o])
    return full


def msm_reference(d1, d2, w1_full, w2_full, bn_scale, bn_bias, num_segments):
    """Pure-JAX reference mirroring the PyTorch forward (eval-mode BN)."""
    nt, c, h, w = d1.shape
    T = num_segments
    n = nt // T
    d1v = d1.reshape(n, T, c, h, w).transpose(0, 2, 1, 3, 4)   # (n, c, T, h, w)
    d2v = d2.reshape(n, T, c, h, w).transpose(0, 2, 1, 3, 4)
    d = d1v.mean(axis=2) + d2v.mean(axis=2)                    # (n, c, h, w)
    dh = jnp.einsum('nchw,cs->nshw', d, w1_full)               # (n, sq, h, w)
    if n != 1:
        dh = dh * bn_scale.reshape(1, -1, 1, 1) + bn_bias.reshape(1, -1, 1, 1)
        dh = jnp.maximum(dh, 0.0)
    dl = jnp.einsum('nshw,so->nohw', dh, w2_full)              # (n, 2c, h, w)
    dl = dl.reshape(n, 2, c, h, w)
    a = jax.nn.softmax(dl, axis=1)
    out = d1v * a[:, 0][:, :, None] + d2v * a[:, 1][:, :, None]
    return out.transpose(0, 2, 1, 3, 4).reshape(nt, c, h, w)


if __name__ == "__main__":
    # Small shapes consistent with the module: input_channel must be divisible
    # by 16 (reduction=4, groups=4).
    num_segments = 8
    c, h, w = 16, 8, 8
    reduction = 4
    groups = 16 // reduction            # 4
    sq = c // reduction                 # 4

    key = jax.random.PRNGKey(0)
    k1, k2, k3, k4 = jax.random.split(key, 4)

    # Deterministic conv weights.  Torch shapes: conv_fc1 (sq, c//groups, 1,1,1),
    # conv_fc2 (2c, sq//groups, 1,1,1).  Keep only the channel dims.
    w1 = 0.1 * jax.random.normal(k3, (sq, c // groups), dtype=jnp.float32)
    w2 = 0.1 * jax.random.normal(k4, (2 * c, sq // groups), dtype=jnp.float32)
    w1_full = expand_grouped_weight(w1, c, groups)        # (c, sq)
    w2_full = expand_grouped_weight(w2, sq, groups)       # (sq, 2c)

    # BatchNorm3d default params, inference mode.
    eps = 1e-5
    gamma = jnp.ones((sq,), jnp.float32)
    beta = jnp.zeros((sq,), jnp.float32)
    running_mean = jnp.zeros((sq,), jnp.float32)
    running_var = jnp.ones((sq,), jnp.float32)
    bn_scale = gamma / jnp.sqrt(running_var + eps)
    bn_bias = beta - running_mean * bn_scale

    # Case 1: n_batch = 2  (BN + ReLU path)
    n_batch = 2
    nt = n_batch * num_segments
    d1 = jax.random.normal(k1, (nt, c, h, w), dtype=jnp.float32)
    d2 = jax.random.normal(k2, (nt, c, h, w), dtype=jnp.float32)
    out = msm_pallas(d1, d2, w1_full, w2_full, bn_scale, bn_bias, num_segments)
    out = jax.block_until_ready(out)
    ref = msm_reference(d1, d2, w1_full, w2_full, bn_scale, bn_bias, num_segments)
    assert out.shape == (nt, c, h, w)
    assert jnp.max(jnp.abs(out - ref)) < 1e-2, "mismatch vs reference (n=2)"

    # Case 2: n_batch = 1  (no-BN path, convs composed into one matmul)
    nt1 = 1 * num_segments
    d1s = d1[:nt1]
    d2s = d2[:nt1]
    out1 = msm_pallas(d1s, d2s, w1_full, w2_full, bn_scale, bn_bias, num_segments)
    out1 = jax.block_until_ready(out1)
    ref1 = msm_reference(d1s, d2s, w1_full, w2_full, bn_scale, bn_bias, num_segments)
    assert out1.shape == (nt1, c, h, w)
    assert jnp.max(jnp.abs(out1 - ref1)) < 1e-2, "mismatch vs reference (n=1)"

    print("KERNEL_OK")
</pallas_src>

<mosaic_0001>
module attributes {stable_mosaic.version = 11 : i64} {
  func.func @kernel(%arg0: i32, %arg1: i32, %arg2: memref<1x8x16x64xf32, #tpu.memory_space<vmem>>, %arg3: memref<1x8x16x64xf32, #tpu.memory_space<vmem>>, %arg4: memref<4x128xf32, #tpu.memory_space<vmem>>, %arg5: memref<4x1xf32, #tpu.memory_space<vmem>>, %arg6: memref<32x4xf32, #tpu.memory_space<vmem>>, %arg7: memref<1x8x16x64xf32, #tpu.memory_space<vmem>>) attributes {dimension_semantics = [#tpu.dimension_semantics<parallel>, #tpu.dimension_semantics<parallel>], iteration_bounds = array<i64: 2, 1>, scalar_prefetch = 0 : i64, scratch_operands = 0 : i64, tpu.core_type = #tpu.core_type<tc>, window_params = [{transform_indices = @transform_0, window_bounds = array<i64: 1, 8, 16, 64>}, {transform_indices = @transform_1, window_bounds = array<i64: 1, 8, 16, 64>}, {pipeline_mode = #tpu.pipeline_mode<synchronous>, transform_indices = @transform_2, window_bounds = array<i64: 4, 128>}, {pipeline_mode = #tpu.pipeline_mode<synchronous>, transform_indices = @transform_3, window_bounds = array<i64: 4, 1>}, {pipeline_mode = #tpu.pipeline_mode<synchronous>, transform_indices = @transform_4, window_bounds = array<i64: 32, 4>}, {transform_indices = @transform_5, window_bounds = array<i64: 1, 8, 16, 64>}]} {
    %c0 = arith.constant 0 : index
    %c0_0 = arith.constant 0 : index
    %c0_1 = arith.constant 0 : index
    %c0_2 = arith.constant 0 : index
    %0 = vector.load %arg2[%c0, %c0_0, %c0_1, %c0_2] : memref<1x8x16x64xf32, #tpu.memory_space<vmem>>, vector<1x8x16x64xf32>
    %1 = vector.shape_cast %0 : vector<1x8x16x64xf32> to vector<8x16x64xf32>
    %c0_3 = arith.constant 0 : index
    %c0_4 = arith.constant 0 : index
    %c0_5 = arith.constant 0 : index
    %c0_6 = arith.constant 0 : index
    %2 = vector.load %arg3[%c0_3, %c0_4, %c0_5, %c0_6] : memref<1x8x16x64xf32, #tpu.memory_space<vmem>>, vector<1x8x16x64xf32>
    %3 = vector.shape_cast %2 : vector<1x8x16x64xf32> to vector<8x16x64xf32>
    %4 = vector.shape_cast %1 : vector<8x16x64xf32> to vector<128x64xf32>
    %5 = vector.shape_cast %3 : vector<8x16x64xf32> to vector<128x64xf32>
    %c0_7 = arith.constant 0 : index
    %c0_8 = arith.constant 0 : index
    %6 = vector.load %arg4[%c0_7, %c0_8] : memref<4x128xf32, #tpu.memory_space<vmem>>, vector<4x128xf32>
    %cst = arith.constant dense<0.000000e+00> : vector<4x64xf32>
    %7 = tpu.matmul %6, %4, %cst {dimension_numbers = #tpu.dot_dimension_numbers<[1], [0], [0], [1], [0, 0, 1, 1], [], []>} : vector<4x128xf32>, vector<128x64xf32>, vector<4x64xf32> -> vector<4x64xf32>
    %c0_9 = arith.constant 0 : index
    %c0_10 = arith.constant 0 : index
    %8 = vector.load %arg4[%c0_9, %c0_10] : memref<4x128xf32, #tpu.memory_space<vmem>>, vector<4x128xf32>
    %cst_11 = arith.constant dense<0.000000e+00> : vector<4x64xf32>
    %9 = tpu.matmul %8, %5, %cst_11 {dimension_numbers = #tpu.dot_dimension_numbers<[1], [0], [0], [1], [0, 0, 1, 1], [], []>} : vector<4x128xf32>, vector<128x64xf32>, vector<4x64xf32> -> vector<4x64xf32>
    %10 = arith.addf %7, %9 : vector<4x64xf32>
    %c0_12 = arith.constant 0 : index
    %c0_13 = arith.constant 0 : index
    %11 = vector.load %arg5[%c0_12, %c0_13] : memref<4x1xf32, #tpu.memory_space<vmem>>, vector<4x1xf32>
    %12 = vector.broadcast %11 : vector<4x1xf32> to vector<4x64xf32>
    %13 = arith.addf %10, %12 : vector<4x64xf32>
    %cst_14 = arith.constant 0.000000e+00 : f32
    %14 = vector.broadcast %cst_14 : f32 to vector<4x64xf32>
    %15 = arith.maximumf %13, %14 : vector<4x64xf32>
    %c0_15 = arith.constant 0 : index
    %c0_16 = arith.constant 0 : index
    %16 = vector.load %arg6[%c0_15, %c0_16] : memref<32x4xf32, #tpu.memory_space<vmem>>, vector<32x4xf32>
    %cst_17 = arith.constant dense<0.000000e+00> : vector<32x64xf32>
    %17 = tpu.matmul %16, %15, %cst_17 {dimension_numbers = #tpu.dot_dimension_numbers<[1], [0], [0], [1], [0, 0, 1, 1], [], []>} : vector<32x4xf32>, vector<4x64xf32>, vector<32x64xf32> -> vector<32x64xf32>
    %18 = vector.extract_strided_slice %17 {offsets = [0, 0], sizes = [16, 64], strides = [1, 1]} : vector<32x64xf32> to vector<16x64xf32>
    %19 = vector.extract_strided_slice %17 {offsets = [16, 0], sizes = [16, 64], strides = [1, 1]} : vector<32x64xf32> to vector<16x64xf32>
    %20 = arith.subf %19, %18 : vector<16x64xf32>
    %21 = math.exp %20 : vector<16x64xf32>
    %cst_18 = arith.constant 1.000000e+00 : f32
    %22 = vector.broadcast %cst_18 : f32 to vector<16x64xf32>
    %23 = arith.addf %22, %21 : vector<16x64xf32>
    %cst_19 = arith.constant 1.000000e+00 : f32
    %24 = vector.broadcast %cst_19 : f32 to vector<16x64xf32>
    %25 = arith.divf %24, %23 : vector<16x64xf32>
    %26 = arith.subf %1, %3 : vector<8x16x64xf32>
    %27 = vector.shape_cast %25 : vector<16x64xf32> to vector<1x16x64xf32>
    %28 = vector.broadcast %27 : vector<1x16x64xf32> to vector<8x16x64xf32>
    %29 = arith.mulf %26, %28 : vector<8x16x64xf32>
    %30 = arith.addf %3, %29 : vector<8x16x64xf32>
    %c0_20 = arith.constant 0 : index
    %c0_21 = arith.constant 0 : index
    %c0_22 = arith.constant 0 : index
    %c0_23 = arith.constant 0 : index
    %31 = vector.load %arg7[%c0_20, %c0_21, %c0_22, %c0_23] : memref<1x8x16x64xf32, #tpu.memory_space<vmem>>, vector<1x8x16x64xf32>
    %32 = vector.shape_cast %31 : vector<1x8x16x64xf32> to vector<8x16x64xf32>
    %33 = vector.shape_cast %30 : vector<8x16x64xf32> to vector<1x8x16x64xf32>
    tpu.vector_store %arg7[%c0_20, %c0_21, %c0_22, %c0_23], %33 {strides = array<i32>} : memref<1x8x16x64xf32, #tpu.memory_space<vmem>>, vector<1x8x16x64xf32>,
    return
  }
  func.func @transform_0(%arg0: i32, %arg1: i32) -> (i32, i32, i32, i32) {
    %c0_i32 = arith.constant 0 : i32
    %c0_i32_0 = arith.constant 0 : i32
    %c0_i32_1 = arith.constant 0 : i32
    return %arg0, %c0_i32, %c0_i32_0, %arg1 : i32, i32, i32, i32
  }
  func.func @transform_1(%arg0: i32, %arg1: i32) -> (i32, i32, i32, i32) {
    %c0_i32 = arith.constant 0 : i32
    %c0_i32_0 = arith.constant 0 : i32
    %c0_i32_1 = arith.constant 0 : i32
    return %arg0, %c0_i32, %c0_i32_0, %arg1 : i32, i32, i32, i32
  }
  func.func @transform_2(%arg0: i32, %arg1: i32) -> (i32, i32) {
    %c0_i32 = arith.constant 0 : i32
    %c0_i32_0 = arith.constant 0 : i32
    %c0_i32_1 = arith.constant 0 : i32
    return %c0_i32, %c0_i32_0 : i32, i32
  }
  func.func @transform_3(%arg0: i32, %arg1: i32) -> (i32, i32) {
    %c0_i32 = arith.constant 0 : i32
    %c0_i32_0 = arith.constant 0 : i32
    %c0_i32_1 = arith.constant 0 : i32
    return %c0_i32, %c0_i32_0 : i32, i32
  }
  func.func @transform_4(%arg0: i32, %arg1: i32) -> (i32, i32) {
    %c0_i32 = arith.constant 0 : i32
    %c0_i32_0 = arith.constant 0 : i32
    %c0_i32_1 = arith.constant 0 : i32
    return %c0_i32, %c0_i32_0 : i32, i32
  }
  func.func @transform_5(%arg0: i32, %arg1: i32) -> (i32, i32, i32, i32) {
    %c0_i32 = arith.constant 0 : i32
    %c0_i32_0 = arith.constant 0 : i32
    %c0_i32_1 = arith.constant 0 : i32
    return %arg0, %c0_i32, %c0_i32_0, %arg1 : i32, i32, i32, i32
  }
}

</mosaic_0001>

<bundles_post_ra>
// kernel: tpu_custom_call.1
= control target key start
LH: loop header
LB: loop body
LE: loop exit
PB: predicated region body
PF: predicated region fallthrough
CT: control target
= control target key end

     0   :  { %s1345_s0 = inlined_call_operand.hbm [shape: f32[2,8,16,64], index: 0, kind: input, shape index: {}]   ;;  %s1346_s1 = inlined_call_operand.hbm [shape: f32[2,8,16,64], index: 1, kind: input, shape index: {}]   ;;  %s1347_s2 = inlined_call_operand.vmem [shape: f32[4,128], index: 2, kind: input, shape index: {}]   ;;  %s1348_s3 = inlined_call_operand.vmem [shape: f32[4,1], index: 3, kind: input, shape index: {}]   ;;  %s1349_s4 = inlined_call_operand.vmem [shape: f32[32,4], index: 4, kind: input, shape index: {}]   ;;  %s1350_s5 = inlined_call_operand.hbm [shape: f32[2,8,16,64], index: 5, kind: output, shape index: {}]  }
   0x1   :  { %1353 = sst [smem:[#allocation13_spill]] %s1345_s0 }
   0x2   :  { %10 = vsyncpa [#allocation3], 0 }
   0x3   :  { %12 = vsyncpa [#allocation3 + $0x1], 0 }
   0x4   :  { %13 = vsyncpa [#allocation6], 0 }
   0x5   :  { %15 = vsyncpa [#allocation6 + $0x1], 0 }
   0x6   :  { %16 = vsyncpa [#allocation4], 0 }
   0x7   :  { %18 = vsyncpa [#allocation4 + $0x1], 0  ;;  %s959_s18 = smov 0   ;;  %s961_s19 = smov 0  }
   0x8   :  { %s963_s20 = smov 0   ;;  %s965_s21 = smov 0  }
   0x9   :  { %s967_s22 = smov 0   ;;  %s969_s23 = smov 0  }
   0xa LB: > { %1354 = sst [smem:[#allocation11_spill]] %s918_s22  ;;  %s668_s24 = sadd.s32 4294967295, %s922_s23   ;;  %s922_s23 = sphi %s969_s23, %s24_s23   ;;  %s918_s22 = sphi %s967_s22, %s1363_s22   ;;  %s914_s21 = sphi %s965_s21, %s1362_s21   ;;  %s910_s20 = sphi %s963_s20, %s1366_s20   ;;  %s906_s19 = sphi %s961_s19, %s1365_s19   ;;  %s902_s18 = sphi %s959_s18, %s1364_s18  }
   0xb   : > { %s669_s25 = sadd.s32 4294967294, %s922_s23   ;;  %s36_s26 = sadd.s32 1, %s918_s22 }
   0xc   : > { %s45_s27 = sadd.s32 1, %s910_s20  ;;  %p38_p0 = scmp.ge.s32.totalorder %s36_s26, 2 }
   0xd   : > { %p52_p1 = scmp.ne.s32.totalorder %s910_s20, %s906_s19  ;;  %p53_p2 = scmp.eq.s32.totalorder %s922_s23, 0 }
   0xe   : > { %p58_p3 = scmp.ne.s32.totalorder %s906_s19, %s902_s18  ;;  %s1368_s26 = smov (%p38_p0, %s36_s26), 0 }
   0xf   : > { %1355 = sst [smem:[#allocation12_spill]] %s1368_s26  ;;  %p1000_p4 = por %p53_p2, %p52_p1 }
  0x10   : > { %p59_p5 = scmp.eq.s32.totalorder %s668_s24, 0  ;;  %s40_s29 = ssub.s32 %s918_s22, %s1368_s26 }
  0x11   : > { %p175_p6 = scmp.eq.s32.totalorder %s668_s24, 1  ;;  %p43_p7 = scmp.eq.s32.totalorder %s40_s29, 0 }
  0x12   : > { %p1006_p8 = por %p59_p5, %p58_p3  ;;  %p181_p10 = scmp.eq.s32.totalorder %s669_s25, 1 }
  0x13   : > { %p1010_p9 = por %p175_p6, %p52_p1  ;;  %p671_p12 = scmp.ge.s32.totalorder %s922_s23, 2 }
  0x14   : > { %s1015_s7 = scalar_select %p43_p7, %s910_s20, %s45_s27  }
  0x15   : > { %p1017_p11 = por %p181_p10, %p58_p3  ;;  %p712_p13 = scmp.lt.s32.totalorder %s922_s23, 2 }
  0x16   : > { %s1024_s9 = sand.u32 1, %s910_s20   ;;  %s692_s11 = sshll.u32 %s918_s22, 7 }
  0x17   : > { %s672_s10 = sshll.u32 %s1024_s9, 7  ;;  %s1360_s0 = sld [smem:[#allocation13_spill]] }
  0x18   : > { %s214_s15 = scalar_lea.vmem [#allocation2], %s672_s10  ;;  %p1033_p0 = pnand %p712_p13, %p1000_p4 }
  0x19   : > { %s223_s16 = sshll.u32 %s214_s15, 4  ;;  %p678_p1 = scmp.ge.s32.totalorder %s922_s23, 1  ;;  %s224_s16 = int_to_ptr.vmem [resolvable:$true] %s223_s16 }
  0x1a   : > { %s211_s25 = scalar_lea.sflag [#allocation3], %s1024_s9  ;;  %s924_s27 = smov 128  }
  0x1b   : > { %s925_s29 = smov 8   ;;  %p254_p2 = scmp.lt.s32.totalorder %s922_s23, 3 }
  0x1c   : > { %s237_s28 = scalar_lea.vmem [#allocation5], %s672_s10  ;;  %s234_s26 = scalar_lea.sflag [#allocation6], %s1024_s9 }
  0x1d   : > { %s220_s14 = scalar_lea.hbm %s1360_s0, %s692_s11  ;;  %p255_p3 = pnand %p678_p1, %p254_p2 }
  0x1e   : > { %s221_s17 = sshll.u32 %s220_s14, 4  ;;  %s243_s14 = scalar_lea.hbm %s1346_s1, %s692_s11  ;;  %s222_s17 = int_to_ptr.hbm [resolvable:$true] %s221_s17 }
  0x1f   : > { %704 = dma.hbm_to_vmem [thread:$0]  (!%p1033_p0), %s222_s17, 2048, %s224_s16, %s211_s25, %s924_s27, %s924_s27, %s925_s29  }
  0x20   : > { %s244_s15 = sshll.u32 %s243_s14, 4  ;;  %s246_s0 = sshll.u32 %s237_s28, 4  ;;  %s245_s15 = int_to_ptr.hbm [resolvable:$true] %s244_s15  ;;  %s247_s0 = int_to_ptr.vmem [resolvable:$true] %s246_s0 }
  0x21   : > { %707 = dma.hbm_to_vmem [thread:$0]  (!%p1033_p0), %s245_s15, 2048, %s247_s0, %s234_s26, %s924_s27, %s924_s27, %s925_s29  }
  0x22   : > { %258 = sbr.rel (%p255_p3) target bundleno = 412 (0x19c), region = 40  ;;  %s1049_s22 = sand.u32 (!%p255_p3), 1, %s906_s19  }
  0x23   : > { %s1052_s16 = sshll.u32 (!%p255_p3), %s1049_s22, 7  ;;  %s261_s11 = scalar_lea.sflag (!%p255_p3), [#allocation3], %s1049_s22 }
  0x24   : > { %s1056_s17 = scalar_lea.vmem (!%p255_p3), [#allocation2], %s1052_s16 }
  0x27   : > { %889 = dma.done.wait (%p1006_p8), %s261_s11, 2048  }
  0x28   : > { %891 = vsyncadd (%p1006_p8), %s261_s11, 4294965248  ;;  %s271_s0 = scalar_lea.sflag [#allocation6], %s1049_s22  ;;  %s1064_s26 = scalar_lea.vmem [#allocation5], %s1052_s16 }
  0x29   : > { %893 = dma.done.wait (%p1006_p8), %s271_s0, 2048  }
  0x2a   : > { %895 = vsyncadd (%p1006_p8), %s271_s0, 4294965248  ;;  %v1071_v0 = vld [vmem:[%s1064_s26 + $0x78] sm:$0xff]  ;;  %v1077_v2 = vld [vmem:[%s1064_s26 + $0x70] sm:$0xff]  ;;  %v926_v6 = vmov 0   ;;  %vm405_vm0 = vcmask 1043456   ;;  %vm392_vm1 = vcmask 31744  }
  0x2b   : > { %v1074_v1 = vld [vmem:[%s1056_s17 + $0x78] sm:$0xff]  ;;  %340 = vmatpush.msra.mxu0 %v1071_v0  ;;  %v1082_v3 = vld [vmem:[%s1056_s17 + $0x70] sm:$0xff]  ;;  %v1085_v4 = vld [vmem:[%s1064_s26 + $0x68] sm:$0xff]  ;;  %767 = vset.pattern.permute.xlu0 %v926_v6  ;;  %vm524_vm6 = vcmask 523264   ;;  %s1242_s11 = scalar_lea.vmem [#allocation7], %s1052_s16  ;;  %s694_s16 = sshll.u32 %s914_s21, 7 }
  0x2c   : > { %360 = vmatpush.msra.mxu1 %v1074_v1  ;;  %v1088_v5 = vld [vmem:[%s1056_s17 + $0x68] sm:$0xff]  ;;  %v1093_v7 = vld [vmem:[%s1064_s26 + $0x60] sm:$0xff]  ;;  %v1101_v9 = vld [vmem:[%s1064_s26 + $0x58] sm:$0xff]  ;;  %s554_s0 = scalar_lea.hbm %s1350_s5, %s694_s16  ;;  %s542_s9 = scalar_lea.sflag [#allocation4], %s1049_s22 }
  0x2d   : > { %341 = vmatpush.msra.mxu0 %v1077_v2  ;;  %v1096_v8 = vld [vmem:[%s1056_s17 + $0x60] sm:$0xff]  ;;  %v1104_v10 = vld [vmem:[%s1056_s17 + $0x58] sm:$0xff]  ;;  %v1109_v11 = vld [vmem:[%s1064_s26 + $0x50] sm:$0xff]  ;;  %s557_s30 = sshll.u32 %s554_s0, 4  ;;  %s856_s29 = scalar_lea.hbm %s1350_s5, 256  ;;  %s558_s30 = int_to_ptr.hbm [resolvable:$true] %s557_s30 }
  0x2e   : > { %361 = vmatpush.msra.mxu1 %v1082_v3  ;;  %v1112_v12 = vld [vmem:[%s1056_s17 + $0x50] sm:$0xff]  ;;  %v1117_v13 = vld [vmem:[%s1064_s26 + $0x48] sm:$0xff]  ;;  %v380_v15 = vld [vmem:[%s1348_s3] sm:$0xf]  ;;  %s850_s10 = sshra.s32 %s558_s30, 4  ;;  %s851_s10 = int_to_ptr.hbm [resolvable:$true] %s850_s10 }
  0x2f   : > { %342 = vmatpush.msra.mxu0 %v1085_v4  ;;  %v1120_v14 = vld [vmem:[%s1056_s17 + $0x48] sm:$0xff]  ;;  %v1128_v16 = vld [vmem:[%s1064_s26 + $0x40] sm:$0xff]  ;;  %383 = vperm.xlu0 %767, %v380_v15   ;;  %v1136_v18 = vld [vmem:[%s1064_s26 + $0x38] sm:$0xff]  ;;  %s852_s24 = scalar_lea.hbm %s851_s10, 128  ;;  %p857_p7 = scmp.lt.s32.totalorder %s851_s10, %s1350_s5 }
  0x30   : > { %362 = vmatpush.msra.mxu1 %v1088_v5  ;;  %v1131_v17 = vld [vmem:[%s1056_s17 + $0x40] sm:$0xff]  ;;  %v1139_v19 = vld [vmem:[%s1056_s17 + $0x38] sm:$0xff]  ;;  %v1144_v20 = vld [vmem:[%s1064_s26 + $0x30] sm:$0xff]  ;;  %p853_p4 = scmp.ne.s32.totalorder %s851_s10, %s852_s24  ;;  %p858_p8 = scmp.lt.s32.totalorder %s856_s29, %s852_s24 }
  0x31   : > { %343 = vmatpush.msra.mxu0 %v1093_v7  ;;  %v1147_v21 = vld [vmem:[%s1056_s17 + $0x30] sm:$0xff]  ;;  %v1152_v22 = vld [vmem:[%s1064_s26 + $0x28] sm:$0xff]  ;;  %v1160_v24 = vld [vmem:[%s1064_s26 + $0x20] sm:$0xff] }
  0x32   : > { %363 = vmatpush.msra.mxu1 %v1096_v8  ;;  %v1155_v23 = vld [vmem:[%s1056_s17 + $0x28] sm:$0xff]  ;;  %v1163_v25 = vld [vmem:[%s1056_s17 + $0x20] sm:$0xff]  ;;  %v1168_v26 = vld [vmem:[%s1064_s26 + $0x18] sm:$0xff]  ;;  %v482_v63 = vsub.f32 %v1147_v21, %v1144_v20  ;;  %p854_p5 = pnand %p853_p4, %p1010_p9  ;;  %p859_p10 = por %p858_p8, %p857_p7 }
  0x33   : > { %344 = vmatpush.msra.mxu0 %v1101_v9  ;;  %v1171_v27 = vld [vmem:[%s1056_s17 + $0x18] sm:$0xff]  ;;  %v1176_v28 = vld [vmem:[%s1064_s26 + $0x10] sm:$0xff]  ;;  %v1184_v30 = vld [vmem:[%s1064_s26 + $0x8] sm:$0xff]  ;;  %v480_v6 = vsub.f32 %v1163_v25, %v1160_v24 }
  0x34   : > { %364 = vmatpush.msra.mxu1 %v1104_v10  ;;  %v1179_v29 = vld [vmem:[%s1056_s17 + $0x10] sm:$0xff]  ;;  %v1187_v31 = vld [vmem:[%s1056_s17 + $0x8] sm:$0xff]  ;;  %v1192_v32 = vld [vmem:[%s1064_s26] sm:$0xff]  ;;  %s555_s26 = sshll.u32 %s1242_s11, 4  ;;  %p855_p6 = pneg %p854_p5  ;;  %s556_s26 = int_to_ptr.vmem [resolvable:$true] %s555_s26 }
  0x35   : > { %345 = vmatpush.msra.mxu0 %v1109_v11  ;;  %v1195_v33 = vld [vmem:[%s1056_s17] sm:$0xff]  ;;  %v389_v42 = vld [vmem:[%s1349_s4 + $0x8] sm:$0xff]  ;;  %v390_v43 = vld [vmem:[%s1349_s4 + $0x10] sm:$0xff]  ;;  %v478_v15 = vsub.f32 %v1179_v29, %v1176_v28 }
  0x36   : > { %365 = vmatpush.msra.mxu1 %v1112_v12  ;;  %v339_v34 = vld [vmem:[%s1347_s2] sm:$0xf]  ;;  %v391_v44 = vld [vmem:[%s1349_s4 + $0x18] sm:$0xff]  ;;  %p860_p13 = pnand %p859_p10, %p855_p6 }
  0x37   : > { %346 = vmatpush.msra.mxu0 %v1117_v13  ;;  %v388_v41 = vld [vmem:[%s1349_s4] sm:$0xff] }
  0x38   : > { %366 = vmatpush.msra.mxu1 %v1120_v14 }
  0x39   : > { %347 = vmatpush.msra.mxu0 %v1128_v16 }
  0x3a   : > { %367 = vmatpush.msra.mxu1 %v1131_v17 }
  0x3b   : > { %348 = vmatpush.msra.mxu0 %v1136_v18 }
  0x3c   : > { %368 = vmatpush.msra.mxu1 %v1139_v19 }
  0x3d   : > { %349 = vmatpush.msra.mxu0 %v1144_v20 }
  0x3e   : > { %369 = vmatpush.msra.mxu1 %v1147_v21 }
  0x3f   : > { %350 = vmatpush.msra.mxu0 %v1152_v22 }
  0x40   : > { %370 = vmatpush.msra.mxu1 %v1155_v23 }
  0x41   : > { %351 = vmatpush.msra.mxu0 %v1160_v24 }
  0x42   : > { %371 = vmatpush.msra.mxu1 %v1163_v25  ;;  %v488_v25 = vsub.f32 %v1096_v8, %v1093_v7 }
  0x43   : > { %352 = vmatpush.msra.mxu0 %v1168_v26 }
  0x44   : > { %372 = vmatpush.msra.mxu1 %v1171_v27 }
  0x45   : > { %353 = vmatpush.msra.mxu0 %v1176_v28 }
  0x46   : > { %373 = vmatpush.msra.mxu1 %v1179_v29  ;;  %v490_v29 = vsub.f32 %v1082_v3, %v1077_v2 }
  0x47   : > { %354 = vmatpush.msra.mxu0 %v1184_v30 }
  0x48   : > { %374 = vmatpush.msra.mxu1 %v1187_v31 }
  0x49   : > { %355 = vmatpush.msra.mxu0 %v1192_v32 }
  0x4a   : > { %375 = vmatpush.msra.mxu1 %v1195_v33  ;;  %356 = vmatmul.f32.vlgmr.msra.gmra.mxu0 %v339_v34 }
  0x4b   : > { %376 = vmatmul.f32.vlgmr.msra.gmra.mxu1 %v339_v34  ;;  %v476_v34 = vsub.f32 %v1195_v33, %v1192_v32 }
  0xa1   : > { %v384_v35 = vpop.permute.xlu0 %383 }
  0xc7   : > { %v357_v36 = vpop.f32.mrf.mxu0 }
  0xc8   : > { %v377_v37 = vpop.f32.mrf.mxu1 }
  0xc9   : > { %v378_v38 = vadd.f32 %v377_v37, %v357_v36  ;;  %v486_v37 = vsub.f32 %v1112_v12, %v1109_v11 }
  0xcb   : > { %v386_v39 = vadd.f32 %v384_v35, %v378_v38  ;;  %v484_v38 = vsub.f32 %v1131_v17, %v1128_v16 }
  0xcd   : > { %v387_v40 = vmax.f32 %v386_v39, 0.0 }
  0xcf   : > { %682 = vmatpush.msk.msra.mxu2 %vm405_vm0, %v387_v40 }
  0xd0   : > { %683 = vmatmul.msk.f32.vlgmr.msra.gmra.mxu2 %vm392_vm1, %v388_v41 }
  0xd8   : > { %684 = vmatmul.msk.f32.gmra.mxu2 %vm392_vm1, %v389_v42 }
  0xe0   : > { %685 = vmatmul.msk.f32.gmra.mxu2 %vm392_vm1, %v390_v43 }
  0xe8   : > { %686 = vmatmul.msk.f32.gmra.mxu2 %vm392_vm1, %v391_v44 }
 0x153   : > { %v426_v45 = vpop.f32.mrf.mxu2 }
 0x15b   : > { %v429_v46 = vpop.f32.mrf.mxu2 }
 0x163   : > { %v432_v47 = vpop.f32.mrf.mxu2 }
 0x164   : > { %v438_v48 = vsub.f32 %v432_v47, %v426_v45 }
 0x166   : > { %v440_v49 = vmul.f32 1.442695, %v438_v48 }
 0x168   : > { %768 = vpow2.f32 %v440_v49 }
 0x16b   : > { %v435_v50 = vpop.f32.mrf.mxu2 }
 0x16c   : > { %v439_v51 = vsub.f32 %v435_v50, %v429_v46 }
 0x16e   : > { %v769_v52 = vpop.eup %768  ;;  %v442_v53 = vmul.f32 1.442695, %v439_v51  ;;  %v483_v51 = vsub.f32 %v1139_v19, %v1136_v18  ;;  %v487_v19 = vsub.f32 %v1104_v10, %v1101_v9 }
 0x16f   : > { %v444_v54 = vadd.f32 1.0, %v769_v52 }
 0x170   : > { %770 = vpow2.f32 %v442_v53  ;;  %v477_v53 = vsub.f32 %v1187_v31, %v1184_v30 }
 0x171   : > { %772 = vrcp.f32 %v444_v54  ;;  %v457_v60 = vand.u32 2147483648, %v444_v54  ;;  %v455_v62 = vand.u32 2147483647, %v444_v54  ;;  %vm451_vm3 = vweird.f32 %v444_v54 }
 0x173   : > { %v458_v21 = vor.u32 1.1754944e-38, %v457_v60  ;;  %vm456_vm5 = vcmp.eq.f32.partialorder %v455_v62, 8.507059e+37 }
 0x176   : > { %v771_v55 = vpop.eup %770 }
 0x177   : > { %v773_v56 = vpop.eup %772  ;;  %v1216_v57 = vadd.f32 1.0, %v771_v55  ;;  %v491_v55 = vsub.f32 %v1074_v1, %v1071_v0 }
 0x178   : > { %v447_v58 = vmul.f32 %v773_v56, %v444_v54  ;;  %vm452_vm2 = vweird.f32 %v773_v56 }
 0x179   : > { %774 = vrcp.f32 %v1216_v57  ;;  %vm453_vm4 = vmor %vm451_vm3, %vm452_vm2  ;;  %vm466_vm8 = vweird.f32 %v1216_v57 }
 0x17a   : > { %v448_v59 = vsub.f32 1.0, %v447_v58 }
 0x17c   : > { %v449_v61 = vmul.f32 %v773_v56, %v448_v59 }
 0x17e   : > { %v450_v35 = vadd.f32 %v773_v56, %v449_v61 }
 0x17f   : > { %v775_v36 = vpop.eup %774 }
 0x180   : > { %v454_v39 = vsel %vm453_vm4, %v773_v56, %v450_v35  ;;  %v462_v40 = vmul.f32 %v775_v36, %v1216_v57  ;;  %vm467_vm7 = vweird.f32 %v775_v36 }
 0x181   : > { %v459_v33 = vsel %vm456_vm5, %v458_v21, %v454_v39  ;;  %vm468_vm9 = vmor %vm466_vm8, %vm467_vm7 }
 0x182   : > { %v492_v41 = vmul.f32 %v476_v34, %v459_v33  ;;  %v494_v42 = vmul.f32 %v478_v15, %v459_v33  ;;  %v496_v12 = vmul.f32 %v480_v6, %v459_v33  ;;  %v498_v43 = vmul.f32 %v482_v63, %v459_v33 }
 0x183   : > { %v500_v44 = vmul.f32 %v484_v38, %v459_v33  ;;  %v502_v17 = vmul.f32 %v486_v37, %v459_v33  ;;  %v504_v45 = vmul.f32 %v488_v25, %v459_v33  ;;  %v506_v48 = vmul.f32 %v490_v29, %v459_v33 }
 0x184   : > { %v508_v46 = vadd.f32 %v492_v41, %v1192_v32  ;;  %v510_v8 = vadd.f32 %v494_v42, %v1176_v28  ;;  %v512_v47 = vadd.f32 %v496_v12, %v1160_v24  ;;  %v514_v3 = vadd.f32 %v498_v43, %v1144_v20 }
 0x185   : > { %v516_v49 = vadd.f32 %v500_v44, %v1128_v16  ;;  %v463_v50 = vsub.f32 1.0, %v462_v40  ;;  %v518_v32 = vadd.f32 %v502_v17, %v1109_v11  ;;  %v472_v24 = vand.u32 2147483648, %v1216_v57 }
 0x186   : > { %525 = vst.msk [vmem:[%s1242_s11] sm:$0xff] %vm524_vm6, %v508_v46  ;;  %v520_v20 = vadd.f32 %v504_v45, %v1093_v7  ;;  %v470_v28 = vand.u32 2147483647, %v1216_v57  ;;  %v481_v11 = vsub.f32 %v1155_v23, %v1152_v22  ;;  %v522_v52 = vadd.f32 %v506_v48, %v1077_v2 }
 0x187   : > { %527 = vst.msk [vmem:[%s1242_s11 + $0x10] sm:$0xff] %vm524_vm6, %v510_v8  ;;  %v464_v16 = vmul.f32 %v775_v36, %v463_v50  ;;  %v479_v7 = vsub.f32 %v1171_v27, %v1168_v26  ;;  %v485_v2 = vsub.f32 %v1120_v14, %v1117_v13  ;;  %v473_v23 = vor.u32 1.1754944e-38, %v472_v24 }
 0x188   : > { %529 = vst.msk [vmem:[%s1242_s11 + $0x20] sm:$0xff] %vm524_vm6, %v512_v47  ;;  %v489_v27 = vsub.f32 %v1088_v5, %v1085_v4  ;;  %vm471_vm10 = vcmp.eq.f32.partialorder %v470_v28, 8.507059e+37 }
 0x189   : > { %531 = vst.msk [vmem:[%s1242_s11 + $0x30] sm:$0xff] %vm524_vm6, %v514_v3  ;;  %v465_v54 = vadd.f32 %v775_v36, %v464_v16 }
 0x18a   : > { %533 = vst.msk [vmem:[%s1242_s11 + $0x40] sm:$0xff] %vm524_vm6, %v516_v49 }
 0x18b   : > { %535 = vst.msk [vmem:[%s1242_s11 + $0x50] sm:$0xff] %vm524_vm6, %v518_v32  ;;  %v469_v31 = vsel %vm468_vm9, %v775_v36, %v465_v54 }
 0x18c   : > { %537 = vst.msk [vmem:[%s1242_s11 + $0x60] sm:$0xff] %vm524_vm6, %v520_v20  ;;  %v474_v10 = vsel %vm471_vm10, %v473_v23, %v469_v31 }
 0x18d   : > { %539 = vst.msk [vmem:[%s1242_s11 + $0x70] sm:$0xff] %vm524_vm6, %v522_v52  ;;  %v493_v14 = vmul.f32 %v477_v53, %v474_v10  ;;  %v495_v56 = vmul.f32 %v479_v7, %v474_v10  ;;  %v497_v57 = vmul.f32 %v481_v11, %v474_v10  ;;  %v499_v58 = vmul.f32 %v483_v51, %v474_v10 }
 0x18e   : > { %v501_v59 = vmul.f32 %v485_v2, %v474_v10  ;;  %v503_v5 = vmul.f32 %v487_v19, %v474_v10  ;;  %v505_v60 = vmul.f32 %v489_v27, %v474_v10  ;;  %v507_v63 = vmul.f32 %v491_v55, %v474_v10 }
 0x18f   : > { %v509_v61 = vadd.f32 %v493_v14, %v1184_v30  ;;  %v511_v1 = vadd.f32 %v495_v56, %v1168_v26  ;;  %v513_v62 = vadd.f32 %v497_v57, %v1152_v22  ;;  %v515_v6 = vadd.f32 %v499_v58, %v1136_v18 }
 0x190   : > { %v517_v15 = vadd.f32 %v501_v59, %v1117_v13  ;;  %v519_v30 = vadd.f32 %v503_v5, %v1101_v9  ;;  %v521_v22 = vadd.f32 %v505_v60, %v1085_v4  ;;  %v523_v26 = vadd.f32 %v507_v63, %v1071_v0 }
 0x191   : > { %526 = vst.msk [vmem:[%s1242_s11 + $0x8] sm:$0xff] %vm524_vm6, %v509_v61 }
 0x192   : > { %528 = vst.msk [vmem:[%s1242_s11 + $0x18] sm:$0xff] %vm524_vm6, %v511_v1 }
 0x193   : > { %530 = vst.msk [vmem:[%s1242_s11 + $0x28] sm:$0xff] %vm524_vm6, %v513_v62 }
 0x194   : > { %532 = vst.msk [vmem:[%s1242_s11 + $0x38] sm:$0xff] %vm524_vm6, %v515_v6 }
 0x195   : > { %534 = vst.msk [vmem:[%s1242_s11 + $0x48] sm:$0xff] %vm524_vm6, %v517_v15 }
 0x196   : > { %536 = vst.msk [vmem:[%s1242_s11 + $0x58] sm:$0xff] %vm524_vm6, %v519_v30 }
 0x197   : > { %538 = vst.msk [vmem:[%s1242_s11 + $0x68] sm:$0xff] %vm524_vm6, %v521_v22 }
 0x198   : > { %540 = vst.msk [vmem:[%s1242_s11 + $0x78] sm:$0xff] %vm524_vm6, %v523_v26 }
 0x199   : > { %863 = shalt.err (!%p860_p13)
}
 0x19a   : > { %s927_s22 = smov 128   ;;  %s928_s14 = smov 8  }
 0x19b   : > { %699 = dma.vmem_to_hbm [thread:$0]  (%p1010_p9), %s556_s26, 2048, %s558_s30, %s542_s9, %s927_s22, %s927_s22, %s928_s14  }
 0x19c PF: > { %s572_s15 = sand.u32 1, %s902_s18   ;;  %p709_p0 = pnand %p671_p12, %p1017_p11 }
 0x19d   : > { %s573_s28 = scalar_lea.sflag [#allocation4], %s572_s15 }
 0x19e   : > { %p710_p1 = pneg %p709_p0 }
 0x1a0   : > { %897 = dma.done.wait (%p710_p1), %s573_s28, 2048  }
 0x1a1   : > { %899 = vsyncadd (%p710_p1), %s573_s28, 4294965248  ;;  %s24_s23 = sadd.s32 1, %s922_s23   ;;  %s1362_s21 = sld [smem:[#allocation11_spill]] }
 0x1a2   : > { %p21_p2 = scmp.ge.s32.totalorder %s24_s23, 4   ;;  %s1363_s22 = sld [smem:[#allocation12_spill]] }
 0x1a3   : > { %s1364_s18 = smov %s906_s19  ;;  %s1365_s19 = smov %s910_s20 }
 0x1a4   : > { %s1366_s20 = smov %s1015_s7  ;;  %23 = sbr.rel (!%p21_p2) target bundleno = 10 (0xa), region = 98 }
 0x1a9   :  { %579 = vsyncpa [#allocation3], 1 }
 0x1aa   :  { %581 = vsyncpa [#allocation3 + $0x1], 1 }
 0x1ab   :  { %582 = vsyncpa [#allocation6], 1 }
 0x1ac   :  { %584 = vsyncpa [#allocation6 + $0x1], 1 }
 0x1ad   :  { %585 = vsyncpa [#allocation4], 1 }
 0x1ae   :  { %587 = vsyncpa [#allocation4 + $0x1], 1 }

</bundles_post_ra>
